<compile_context>
chip_gen: v6e
topology: v6e:2x2x1
jax: 0.10.0
libtpu: 0.0.40
codegen_flags: <defaults>
</compile_context>

<pallas_src>
import functools

import jax
import jax.numpy as jnp
from jax.experimental import pallas as pl
from jax.experimental.pallas import tpu as pltpu


# --------------------------------------------------------------------------- #
# Kernel
# --------------------------------------------------------------------------- #
def _papi_loss_kernel(scalars_ref,                       # SMEM (2,): [lam, 1/tau]
                      cls_out1_ref, prot1_mix_ref, prot2_mix_ref,
                      tgt1_ref, tgt1_rp_ref,             # VMEM (TB, C) tiles
                      cls_out_ref, sim_out_ref,          # VMEM (1, 8, 128) per-split outputs
                      acc_ref,                           # SMEM (2,) per-core accumulator
                      *, total_b, tile_b, steps_per_split, need_mask):
    lam = scalars_ref[0]
    inv_tau = scalars_ref[1]
    c = pl.program_id(0)          # parallel split (megacore on v7x)
    i = pl.program_id(1)          # batch-tile step within this split

    x = cls_out1_ref[...].astype(jnp.float32)
    z1 = prot1_mix_ref[...].astype(jnp.float32) * inv_tau   # scalar 1/tau, no vector divide
    z2 = prot2_mix_ref[...].astype(jnp.float32) * inv_tau
    t1 = tgt1_ref[...].astype(jnp.float32)
    trp = tgt1_rp_ref[...].astype(jnp.float32)

    # Trace-time branch: masking only compiled when the grid over-covers B.
    if need_mask:
        row0 = (c * steps_per_split + i) * tile_b
        row = row0 + jax.lax.broadcasted_iota(jnp.int32, (tile_b, 1), 0)
        valid = row < total_b
        x = jnp.where(valid, x, 0.0)
        z1 = jnp.where(valid, z1, 0.0)
        z2 = jnp.where(valid, z2, 0.0)
        t1 = jnp.where(valid, t1, 0.0)
        trp = jnp.where(valid, trp, 0.0)

    def log_softmax(z):
        zs = z - jnp.max(z, axis=1, keepdims=True)
        return zs - jnp.log(jnp.sum(jnp.exp(zs), axis=1, keepdims=True))

    # ---- cls_loss_1 partial: sum over this tile of -(t1 * log_softmax(x)) ----
    cls_part = -jnp.sum(t1 * log_softmax(x))

    # ---- sim loss partial (fused KLDivLoss(batchmean) branches) ----
    # Over the accumulated full batch, entropy(trp) == entropy(t1) since idx_rp
    # is a permutation of the batch, so the entropy terms collapse to 2*H(t1).
    lp_sum = log_softmax(z1) + log_softmax(z2)
    t_mix = lam * t1 + (1.0 - lam) * trp
    ent1 = jnp.sum(t1 * jnp.log(jnp.where(t1 > 0.0, t1, 1.0)))   # 0*log(0) := 0
    sim_part = 2.0 * ent1 - jnp.sum(t_mix * lp_sum)

    @pl.when(i == 0)
    def _init():
        acc_ref[0] = jnp.float32(0.0)
        acc_ref[1] = jnp.float32(0.0)

    acc_ref[0] += cls_part
    acc_ref[1] += sim_part

    # Finalize only on the last step of this split; wrapper sums the splits.
    # TODO(synk): replace per-step scalar tree-reduces with an (8,128) VMEM vreg
    # accumulator collapsed only here, if EUP/XLU ever becomes binding.
    @pl.when(i == pl.num_programs(1) - 1)
    def _finalize():
        inv_b = jnp.float32(1.0 / total_b)
        ones = jnp.ones((1, 8, 128), jnp.float32)
        cls_out_ref[...] = ones * (acc_ref[0] * inv_b)
        sim_out_ref[...] = ones * (acc_ref[1] * inv_b)


# --------------------------------------------------------------------------- #
# Tiling / VMEM planning
# --------------------------------------------------------------------------- #
def _vmem_plan():
    """Per-generation scoped-VMEM target (v5e/v6e: 128 MiB physical, v7x: 64 MiB)."""
    try:
        cap = int(pltpu.get_tpu_info().vmem_capacity_bytes)
        if cap <= 0:
            raise ValueError
    except Exception:
        cap = 64 * 1024 * 1024                       # conservative (v7x per-core)
    scoped_limit = min((cap * 3) // 4, 96 * 1024 * 1024)
    tile_budget = (scoped_limit * 85) // 100         # small fixed-overhead headroom
    return scoped_limit, tile_budget


def _choose_tile_b(B, C, in_bytes_per_elem, tile_budget_bytes):
    """Batch tile sized strictly by bytes: 5 inputs x 2 pipeline buffers (input
    dtype) + ~4 tile-sized f32 compiler temporaries (lp1/lp2/lp_sum/t_mix)."""
    per_row = 2 * C * in_bytes_per_elem + 4 * C * 4
    tb = max(8, int(tile_budget_bytes // max(per_row, 1)))
    tb = (tb // 8) * 8
    if B <= tb:
        return B
    # Prefer a tile that divides B exactly (drops per-step masking), as long as
    # it stays within 2x of the budget-optimal size.
    d = tb
    while d >= max(8, tb // 2):
        if B % d == 0:
            return d
        d -= 8
    return tb


# --------------------------------------------------------------------------- #
# pallas_call wrapper
# --------------------------------------------------------------------------- #
def _papi_loss_call(cls_out1, prot1_mix, prot2_mix, tgt1, tgt1_rp,
                    lam, tau_proto, *, block_b=None, num_splits=2):
    B, C = cls_out1.shape
    inputs = (cls_out1, prot1_mix, prot2_mix, tgt1, tgt1_rp)
    scoped_limit, tile_budget = _vmem_plan()
    in_bytes_per_elem = sum(a.dtype.itemsize for a in inputs)

    if block_b is None:
        tb = _choose_tile_b(B, C, in_bytes_per_elem, tile_budget)
    else:
        tb = B if B <= block_b else max(8, (block_b // 8) * 8)

    nblocks = -(-B // tb)
    splits = num_splits if nblocks >= num_splits else 1
    steps = -(-nblocks // splits)
    need_mask = (splits * steps * tb) != B
    need_clamp = (splits * steps) > nblocks

    def tile_map(c, i):
        blk = c * steps + i
        if need_clamp:
            blk = jnp.minimum(blk, nblocks - 1)   # duplicated block is fully masked
        return (blk, 0)

    scalars = jnp.asarray([lam, 1.0 / tau_proto], dtype=jnp.float32)

    smem_spec = pl.BlockSpec(memory_space=pltpu.MemorySpace.SMEM)
    tile_spec = pl.BlockSpec((tb, C), tile_map)
    out_spec = pl.BlockSpec((1, 8, 128), lambda c, i: (c, 0, 0))

    kernel = functools.partial(_papi_loss_kernel, total_b=B, tile_b=tb,
                               steps_per_split=steps, need_mask=need_mask)

    bytes_accessed = int(sum(a.size * a.dtype.itemsize for a in inputs))
    cost = pl.CostEstimate(flops=int(22 * B * C),
                           transcendentals=int(4 * B * C),
                           bytes_accessed=bytes_accessed)

    cls_p, sim_p = pl.pallas_call(
        kernel,
        out_shape=(jax.ShapeDtypeStruct((splits, 8, 128), jnp.float32),
                   jax.ShapeDtypeStruct((splits, 8, 128), jnp.float32)),
        grid_spec=pltpu.PrefetchScalarGridSpec(
            num_scalar_prefetch=0,
            grid=(splits, steps),
            in_specs=[smem_spec,
                      tile_spec, tile_spec, tile_spec, tile_spec, tile_spec],
            out_specs=(out_spec, out_spec),
            scratch_shapes=[pltpu.SMEM((2,), jnp.float32)]),
        compiler_params=pltpu.CompilerParams(
            dimension_semantics=("parallel", "arbitrary"),
            vmem_limit_bytes=int(scoped_limit)),
        cost_estimate=cost,
    )(scalars, cls_out1, prot1_mix, prot2_mix, tgt1, tgt1_rp)

    cls_loss = jnp.sum(cls_p[:, 0, 0])
    sim_loss = jnp.sum(sim_p[:, 0, 0])
    return cls_loss, sim_loss


# --------------------------------------------------------------------------- #
# Module
# --------------------------------------------------------------------------- #
class PaPiLossPallas:
    """JAX/Pallas port of PaPiLoss (forward only)."""

    def __init__(self, predicted_score_cls, pseudo_label_weight=0.99):
        self.predicted_score_cls1 = predicted_score_cls
        self.predicted_score_cls2 = predicted_score_cls
        self.init_predicted_score_cls = predicted_score_cls
        self.pseudo_label_weight = pseudo_label_weight
        self.alpha = 0.0

    def set_alpha(self, epoch, alpha_weight):
        self.alpha = min(epoch / 10 * alpha_weight, alpha_weight)

    def forward(self, cls_out1, cls_out2, logits_prot1, logits_prot2,
                logits_prot_1_mix, logits_prot_2_mix, idx_rp, Lambda, index,
                tau_proto):
        # cls_out2 / logits_prot1 / logits_prot2 are unused in the reference forward.
        # Composed indices: the permuted target is one direct gather from the
        # pseudo-label table (no gather-over-the-gathered intermediate).
        tgt1 = self.predicted_score_cls1[index, :]
        tgt1_rp = self.predicted_score_cls1[index[idx_rp], :]
        # TODO(synk): gather the pseudo-label rows inside the kernel (scalar-
        # prefetched index arrays) so tgt1/tgt1_rp never hit HBM as dense (B,C).
        # TODO(synk): if C < 128 and upstream can fuse it, feed a lane-dense
        # (C, B) layout to stop wasting 128-C lanes per vreg.
        cls_loss_1, sim_loss_2 = _papi_loss_call(
            cls_out1, logits_prot_1_mix, logits_prot_2_mix,
            tgt1, tgt1_rp, Lambda, tau_proto)
        return cls_loss_1, sim_loss_2, self.alpha


# --------------------------------------------------------------------------- #
# Pure-JAX reference (mirrors the torch code) + tests
# --------------------------------------------------------------------------- #
def _reference(cls_out1, prot1_mix, prot2_mix, tgt1, tgt1_rp, lam, tau):
    logp = jax.nn.log_softmax(cls_out1, axis=1)
    cls_loss = -jnp.mean(jnp.sum(tgt1 * logp, axis=1))
    lp1 = jax.nn.log_softmax(prot1_mix / tau, axis=1)
    lp2 = jax.nn.log_softmax(prot2_mix / tau, axis=1)
    B = cls_out1.shape[0]

    def kl(log_input, t):
        return jnp.sum(jnp.where(t > 0, t * jnp.log(jnp.where(t > 0, t, 1.0)), 0.0)
                       - t * log_input) / B

    sim = (lam * kl(lp1, tgt1) + (1 - lam) * kl(lp1, tgt1_rp)
           + lam * kl(lp2, tgt1) + (1 - lam) * kl(lp2, tgt1_rp))
    return cls_loss, sim


if __name__ == "__main__":
    key = jax.random.PRNGKey(0)

    # ---------- test 1: module API, single tile (B <= tile) ----------
    N, B, C = 32, 8, 16          # dataset size, batch, num classes
    k = jax.random.split(key, 8)
    raw = jax.nn.softmax(jax.random.normal(k[0], (N, C), jnp.float32), axis=1)
    loss_mod = PaPiLossPallas(raw, pseudo_label_weight=0.99)
    loss_mod.set_alpha(epoch=5, alpha_weight=1.0)   # -> alpha = 0.5

    cls_out1 = jax.random.normal(k[1], (B, C), jnp.float32)
    cls_out2 = jax.random.normal(k[2], (B, C), jnp.float32)          # unused
    logits_prot1 = jax.random.normal(k[3], (B, C), jnp.float32)      # unused
    logits_prot2 = jax.random.normal(k[4], (B, C), jnp.float32)      # unused
    logits_prot_1_mix = jax.random.normal(k[5], (B, C), jnp.float32)
    logits_prot_2_mix = jax.random.normal(k[6], (B, C), jnp.float32)
    index = jnp.arange(B, dtype=jnp.int32)
    idx_rp = jax.random.permutation(k[7], B).astype(jnp.int32)
    Lambda = 0.7
    tau_proto = 0.3

    cls_loss_1, sim_loss_2, alpha = loss_mod.forward(
        cls_out1, cls_out2, logits_prot1, logits_prot2,
        logits_prot_1_mix, logits_prot_2_mix, idx_rp, Lambda, index, tau_proto)
    jax.block_until_ready((cls_loss_1, sim_loss_2))

    tgt1 = raw[index, :]
    tgt1_rp = raw[index[idx_rp], :]
    ref_cls, ref_sim = _reference(cls_out1, logits_prot_1_mix, logits_prot_2_mix,
                                  tgt1, tgt1_rp, Lambda, tau_proto)
    assert jnp.allclose(cls_loss_1, ref_cls, rtol=2e-5, atol=1e-4)
    assert jnp.allclose(sim_loss_2, ref_sim, rtol=2e-5, atol=1e-4)
    assert alpha == 0.5

    # ---------- test 2: split grid with clamped + masked partial coverage ----------
    N2, B2, C2 = 64, 40, 16
    k2 = jax.random.split(jax.random.PRNGKey(1), 8)
    raw2 = jax.nn.softmax(jax.random.normal(k2[0], (N2, C2), jnp.float32), axis=1)
    cls2 = jax.random.normal(k2[1], (B2, C2), jnp.float32)
    p1m2 = jax.random.normal(k2[2], (B2, C2), jnp.float32)
    p2m2 = jax.random.normal(k2[3], (B2, C2), jnp.float32)
    index2 = jax.random.randint(k2[4], (B2,), 0, N2, dtype=jnp.int32)
    idx_rp2 = jax.random.permutation(k2[5], B2).astype(jnp.int32)
    tgt1_b = raw2[index2, :]
    tgt1_rp_b = raw2[index2[idx_rp2], :]
    lam2, tau2 = 0.4, 0.5

    # block_b=16 -> 3 blocks, 2 parallel splits x 2 steps, masking + clamping active
    cls_t2, sim_t2 = _papi_loss_call(cls2, p1m2, p2m2, tgt1_b, tgt1_rp_b,
                                     lam2, tau2, block_b=16)
    jax.block_until_ready((cls_t2, sim_t2))
    ref_cls2, ref_sim2 = _reference(cls2, p1m2, p2m2, tgt1_b, tgt1_rp_b, lam2, tau2)
    assert jnp.allclose(cls_t2, ref_cls2, rtol=2e-5, atol=1e-4)
    assert jnp.allclose(sim_t2, ref_sim2, rtol=2e-5, atol=1e-4)

    # ---------- test 3: even split, no masking path ----------
    B3 = 64
    k3 = jax.random.split(jax.random.PRNGKey(2), 8)
    raw3 = jax.nn.softmax(jax.random.normal(k3[0], (N2, C2), jnp.float32), axis=1)
    cls3 = jax.random.normal(k3[1], (B3, C2), jnp.float32)
    p1m3 = jax.random.normal(k3[2], (B3, C2), jnp.float32)
    p2m3 = jax.random.normal(k3[3], (B3, C2), jnp.float32)
    index3 = jax.random.randint(k3[4], (B3,), 0, N2, dtype=jnp.int32)
    idx_rp3 = jax.random.permutation(k3[5], B3).astype(jnp.int32)
    tgt1_c = raw3[index3, :]
    tgt1_rp_c = raw3[index3[idx_rp3], :]

    cls_t3, sim_t3 = _papi_loss_call(cls3, p1m3, p2m3, tgt1_c, tgt1_rp_c,
                                     0.6, 0.25, block_b=16)   # 4 blocks -> 2x2, exact cover
    jax.block_until_ready((cls_t3, sim_t3))
    ref_cls3, ref_sim3 = _reference(cls3, p1m3, p2m3, tgt1_c, tgt1_rp_c, 0.6, 0.25)
    assert jnp.allclose(cls_t3, ref_cls3, rtol=2e-5, atol=1e-4)
    assert jnp.allclose(sim_t3, ref_sim3, rtol=2e-5, atol=1e-4)

    print("KERNEL_OK")
</pallas_src>

<mosaic_0001>
module attributes {stable_mosaic.version = 11 : i64} {
  func.func @_papi_loss_kernel(%arg0: i32, %arg1: i32, %arg2: memref<2xf32, #tpu.memory_space<smem>>, %arg3: memref<8x16xf32, #tpu.memory_space<vmem>>, %arg4: memref<8x16xf32, #tpu.memory_space<vmem>>, %arg5: memref<8x16xf32, #tpu.memory_space<vmem>>, %arg6: memref<8x16xf32, #tpu.memory_space<vmem>>, %arg7: memref<8x16xf32, #tpu.memory_space<vmem>>, %arg8: memref<1x8x128xf32, #tpu.memory_space<vmem>>, %arg9: memref<1x8x128xf32, #tpu.memory_space<vmem>>, %arg10: memref<2xf32, #tpu.memory_space<smem>>) attributes {dimension_semantics = [#tpu.dimension_semantics<parallel>, #tpu.dimension_semantics<arbitrary>], iteration_bounds = array<i64: 1, 1>, scalar_prefetch = 0 : i64, scratch_operands = 1 : i64, tpu.core_type = #tpu.core_type<tc>, window_params = [{transform_indices = @transform_0, window_bounds = array<i64: 2>}, {transform_indices = @transform_1, window_bounds = array<i64: 8, 16>}, {transform_indices = @transform_2, window_bounds = array<i64: 8, 16>}, {transform_indices = @transform_3, window_bounds = array<i64: 8, 16>}, {transform_indices = @transform_4, window_bounds = array<i64: 8, 16>}, {transform_indices = @transform_5, window_bounds = array<i64: 8, 16>}, {transform_indices = @transform_6, window_bounds = array<i64: 1, 8, 128>}, {transform_indices = @transform_7, window_bounds = array<i64: 1, 8, 128>}]} {
    %c0 = arith.constant 0 : index
    %0 = memref.load %arg2[%c0] : memref<2xf32, #tpu.memory_space<smem>>
    %c1 = arith.constant 1 : index
    %1 = memref.load %arg2[%c1] : memref<2xf32, #tpu.memory_space<smem>>
    %c0_0 = arith.constant 0 : index
    %c0_1 = arith.constant 0 : index
    %2 = vector.load %arg3[%c0_0, %c0_1] : memref<8x16xf32, #tpu.memory_space<vmem>>, vector<8x16xf32>
    %c0_2 = arith.constant 0 : index
    %c0_3 = arith.constant 0 : index
    %3 = vector.load %arg4[%c0_2, %c0_3] : memref<8x16xf32, #tpu.memory_space<vmem>>, vector<8x16xf32>
    %4 = vector.broadcast %1 : f32 to vector<8x16xf32>
    %5 = arith.mulf %3, %4 : vector<8x16xf32>
    %c0_4 = arith.constant 0 : index
    %c0_5 = arith.constant 0 : index
    %6 = vector.load %arg5[%c0_4, %c0_5] : memref<8x16xf32, #tpu.memory_space<vmem>>, vector<8x16xf32>
    %7 = vector.broadcast %1 : f32 to vector<8x16xf32>
    %8 = arith.mulf %6, %7 : vector<8x16xf32>
    %c0_6 = arith.constant 0 : index
    %c0_7 = arith.constant 0 : index
    %9 = vector.load %arg6[%c0_6, %c0_7] : memref<8x16xf32, #tpu.memory_space<vmem>>, vector<8x16xf32>
    %c0_8 = arith.constant 0 : index
    %c0_9 = arith.constant 0 : index
    %10 = vector.load %arg7[%c0_8, %c0_9] : memref<8x16xf32, #tpu.memory_space<vmem>>, vector<8x16xf32>
    %cst = arith.constant dense<0xFF800000> : vector<8xf32>
    %11 = vector.multi_reduction <maximumf>, %2, %cst [1] : vector<8x16xf32> to vector<8xf32>
    %12 = vector.shape_cast %11 : vector<8xf32> to vector<8x1xf32>
    %13 = vector.broadcast %12 : vector<8x1xf32> to vector<8x16xf32>
    %14 = arith.subf %2, %13 : vector<8x16xf32>
    %15 = math.exp %14 : vector<8x16xf32>
    %cst_10 = arith.constant dense<0.000000e+00> : vector<8xf32>
    %16 = vector.multi_reduction <add>, %15, %cst_10 [1] : vector<8x16xf32> to vector<8xf32>
    %17 = vector.shape_cast %16 : vector<8xf32> to vector<8x1xf32>
    %18 = math.log %17 : vector<8x1xf32>
    %19 = vector.broadcast %18 : vector<8x1xf32> to vector<8x16xf32>
    %20 = arith.subf %14, %19 : vector<8x16xf32>
    %21 = arith.mulf %9, %20 : vector<8x16xf32>
    %22 = vector.shape_cast %21 : vector<8x16xf32> to vector<1x8x16xf32>
    %cst_11 = arith.constant dense<0.000000e+00> : vector<1xf32>
    %23 = vector.multi_reduction <add>, %22, %cst_11 [1, 2] : vector<1x8x16xf32> to vector<1xf32>
    %24 = vector.shape_cast %23 : vector<1xf32> to vector<1x1x1xf32>
    %25 = vector.extract %24[0, 0, 0] : f32 from vector<1x1x1xf32>
    %cst_12 = arith.constant 0.000000e+00 : f32
    %26 = arith.subf %cst_12, %25 : f32
    %cst_13 = arith.constant dense<0xFF800000> : vector<8xf32>
    %27 = vector.multi_reduction <maximumf>, %5, %cst_13 [1] : vector<8x16xf32> to vector<8xf32>
    %28 = vector.shape_cast %27 : vector<8xf32> to vector<8x1xf32>
    %29 = vector.broadcast %28 : vector<8x1xf32> to vector<8x16xf32>
    %30 = arith.subf %5, %29 : vector<8x16xf32>
    %31 = math.exp %30 : vector<8x16xf32>
    %cst_14 = arith.constant dense<0.000000e+00> : vector<8xf32>
    %32 = vector.multi_reduction <add>, %31, %cst_14 [1] : vector<8x16xf32> to vector<8xf32>
    %33 = vector.shape_cast %32 : vector<8xf32> to vector<8x1xf32>
    %34 = math.log %33 : vector<8x1xf32>
    %35 = vector.broadcast %34 : vector<8x1xf32> to vector<8x16xf32>
    %36 = arith.subf %30, %35 : vector<8x16xf32>
    %cst_15 = arith.constant dense<0xFF800000> : vector<8xf32>
    %37 = vector.multi_reduction <maximumf>, %8, %cst_15 [1] : vector<8x16xf32> to vector<8xf32>
    %38 = vector.shape_cast %37 : vector<8xf32> to vector<8x1xf32>
    %39 = vector.broadcast %38 : vector<8x1xf32> to vector<8x16xf32>
    %40 = arith.subf %8, %39 : vector<8x16xf32>
    %41 = math.exp %40 : vector<8x16xf32>
    %cst_16 = arith.constant dense<0.000000e+00> : vector<8xf32>
    %42 = vector.multi_reduction <add>, %41, %cst_16 [1] : vector<8x16xf32> to vector<8xf32>
    %43 = vector.shape_cast %42 : vector<8xf32> to vector<8x1xf32>
    %44 = math.log %43 : vector<8x1xf32>
    %45 = vector.broadcast %44 : vector<8x1xf32> to vector<8x16xf32>
    %46 = arith.subf %40, %45 : vector<8x16xf32>
    %47 = arith.addf %36, %46 : vector<8x16xf32>
    %48 = vector.broadcast %0 : f32 to vector<8x16xf32>
    %49 = arith.mulf %48, %9 : vector<8x16xf32>
    %cst_17 = arith.constant 1.000000e+00 : f32
    %50 = arith.subf %cst_17, %0 : f32
    %51 = vector.broadcast %50 : f32 to vector<8x16xf32>
    %52 = arith.mulf %51, %10 : vector<8x16xf32>
    %53 = arith.addf %49, %52 : vector<8x16xf32>
    %cst_18 = arith.constant 0.000000e+00 : f32
    %54 = vector.broadcast %cst_18 : f32 to vector<8x16xf32>
    %55 = arith.cmpf ogt, %9, %54 : vector<8x16xf32>
    %cst_19 = arith.constant 1.000000e+00 : f32
    %56 = vector.broadcast %cst_19 : f32 to vector<8x16xf32>
    %57 = arith.select %55, %9, %56 : vector<8x16xi1>, vector<8x16xf32>
    %58 = math.log %57 : vector<8x16xf32>
    %59 = arith.mulf %9, %58 : vector<8x16xf32>
    %60 = vector.shape_cast %59 : vector<8x16xf32> to vector<1x8x16xf32>
    %cst_20 = arith.constant dense<0.000000e+00> : vector<1xf32>
    %61 = vector.multi_reduction <add>, %60, %cst_20 [1, 2] : vector<1x8x16xf32> to vector<1xf32>
    %62 = vector.shape_cast %61 : vector<1xf32> to vector<1x1x1xf32>
    %63 = vector.extract %62[0, 0, 0] : f32 from vector<1x1x1xf32>
    %cst_21 = arith.constant 2.000000e+00 : f32
    %64 = arith.mulf %cst_21, %63 : f32
    %65 = arith.mulf %53, %47 : vector<8x16xf32>
    %66 = vector.shape_cast %65 : vector<8x16xf32> to vector<1x8x16xf32>
    %cst_22 = arith.constant dense<0.000000e+00> : vector<1xf32>
    %67 = vector.multi_reduction <add>, %66, %cst_22 [1, 2] : vector<1x8x16xf32> to vector<1xf32>
    %68 = vector.shape_cast %67 : vector<1xf32> to vector<1x1x1xf32>
    %69 = vector.extract %68[0, 0, 0] : f32 from vector<1x1x1xf32>
    %70 = arith.subf %64, %69 : f32
    %c0_i32 = arith.constant 0 : i32
    %71 = arith.cmpi eq, %arg1, %c0_i32 : i32
    %72 = arith.extui %71 : i1 to i32
    %c0_i32_23 = arith.constant 0 : i32
    %73 = arith.cmpi ne, %72, %c0_i32_23 : i32
    scf.if %73 {
      %cst_30 = arith.constant 0.000000e+00 : f32
      %c0_31 = arith.constant 0 : index
      %83 = memref.load %arg10[%c0_31] : memref<2xf32, #tpu.memory_space<smem>>
      memref.store %cst_30, %arg10[%c0_31] : memref<2xf32, #tpu.memory_space<smem>>
      %cst_32 = arith.constant 0.000000e+00 : f32
      %c1_33 = arith.constant 1 : index
      %84 = memref.load %arg10[%c1_33] : memref<2xf32, #tpu.memory_space<smem>>
      memref.store %cst_32, %arg10[%c1_33] : memref<2xf32, #tpu.memory_space<smem>>
    } else {
    }
    %c0_24 = arith.constant 0 : index
    %74 = memref.load %arg10[%c0_24] : memref<2xf32, #tpu.memory_space<smem>>
    %75 = arith.addf %74, %26 : f32
    %c0_25 = arith.constant 0 : index
    %76 = memref.load %arg10[%c0_25] : memref<2xf32, #tpu.memory_space<smem>>
    memref.store %75, %arg10[%c0_25] : memref<2xf32, #tpu.memory_space<smem>>
    %c1_26 = arith.constant 1 : index
    %77 = memref.load %arg10[%c1_26] : memref<2xf32, #tpu.memory_space<smem>>
    %78 = arith.addf %77, %70 : f32
    %c1_27 = arith.constant 1 : index
    %79 = memref.load %arg10[%c1_27] : memref<2xf32, #tpu.memory_space<smem>>
    memref.store %78, %arg10[%c1_27] : memref<2xf32, #tpu.memory_space<smem>>
    %c0_i32_28 = arith.constant 0 : i32
    %80 = arith.cmpi eq, %arg1, %c0_i32_28 : i32
    %81 = arith.extui %80 : i1 to i32
    %c0_i32_29 = arith.constant 0 : i32
    %82 = arith.cmpi ne, %81, %c0_i32_29 : i32
    scf.if %82 {
      %cst_30 = arith.constant 1.000000e+00 : f32
      %83 = vector.broadcast %cst_30 : f32 to vector<1x8x128xf32>
      %c0_31 = arith.constant 0 : index
      %84 = memref.load %arg10[%c0_31] : memref<2xf32, #tpu.memory_space<smem>>
      %cst_32 = arith.constant 1.250000e-01 : f32
      %85 = arith.mulf %84, %cst_32 : f32
      %86 = vector.broadcast %85 : f32 to vector<1x8x128xf32>
      %87 = arith.mulf %83, %86 : vector<1x8x128xf32>
      %c0_33 = arith.constant 0 : index
      %c0_34 = arith.constant 0 : index
      %c0_35 = arith.constant 0 : index
      %88 = vector.load %arg8[%c0_33, %c0_34, %c0_35] : memref<1x8x128xf32, #tpu.memory_space<vmem>>, vector<1x8x128xf32>
      tpu.vector_store %arg8[%c0_33, %c0_34, %c0_35], %87 {strides = array<i32>} : memref<1x8x128xf32, #tpu.memory_space<vmem>>, vector<1x8x128xf32>,
      %c1_36 = arith.constant 1 : index
      %89 = memref.load %arg10[%c1_36] : memref<2xf32, #tpu.memory_space<smem>>
      %cst_37 = arith.constant 1.250000e-01 : f32
      %90 = arith.mulf %89, %cst_37 : f32
      %91 = vector.broadcast %90 : f32 to vector<1x8x128xf32>
      %92 = arith.mulf %83, %91 : vector<1x8x128xf32>
      %c0_38 = arith.constant 0 : index
      %c0_39 = arith.constant 0 : index
      %c0_40 = arith.constant 0 : index
      %93 = vector.load %arg9[%c0_38, %c0_39, %c0_40] : memref<1x8x128xf32, #tpu.memory_space<vmem>>, vector<1x8x128xf32>
      tpu.vector_store %arg9[%c0_38, %c0_39, %c0_40], %92 {strides = array<i32>} : memref<1x8x128xf32, #tpu.memory_space<vmem>>, vector<1x8x128xf32>,
    } else {
    }
    return
  }
  func.func @transform_0(%arg0: i32, %arg1: i32) -> i32 {
    %c0_i32 = arith.constant 0 : i32
    %c0_i32_0 = arith.constant 0 : i32
    return %c0_i32 : i32
  }
  func.func @transform_1(%arg0: i32, %arg1: i32) -> (i32, i32) {
    %c1_i32 = arith.constant 1 : i32
    %0 = arith.muli %arg0, %c1_i32 : i32
    %1 = arith.addi %0, %arg1 : i32
    %c0_i32 = arith.constant 0 : i32
    %c0_i32_0 = arith.constant 0 : i32
    return %1, %c0_i32 : i32, i32
  }
  func.func @transform_2(%arg0: i32, %arg1: i32) -> (i32, i32) {
    %c1_i32 = arith.constant 1 : i32
    %0 = arith.muli %arg0, %c1_i32 : i32
    %1 = arith.addi %0, %arg1 : i32
    %c0_i32 = arith.constant 0 : i32
    %c0_i32_0 = arith.constant 0 : i32
    return %1, %c0_i32 : i32, i32
  }
  func.func @transform_3(%arg0: i32, %arg1: i32) -> (i32, i32) {
    %c1_i32 = arith.constant 1 : i32
    %0 = arith.muli %arg0, %c1_i32 : i32
    %1 = arith.addi %0, %arg1 : i32
    %c0_i32 = arith.constant 0 : i32
    %c0_i32_0 = arith.constant 0 : i32
    return %1, %c0_i32 : i32, i32
  }
  func.func @transform_4(%arg0: i32, %arg1: i32) -> (i32, i32) {
    %c1_i32 = arith.constant 1 : i32
    %0 = arith.muli %arg0, %c1_i32 : i32
    %1 = arith.addi %0, %arg1 : i32
    %c0_i32 = arith.constant 0 : i32
    %c0_i32_0 = arith.constant 0 : i32
    return %1, %c0_i32 : i32, i32
  }
  func.func @transform_5(%arg0: i32, %arg1: i32) -> (i32, i32) {
    %c1_i32 = arith.constant 1 : i32
    %0 = arith.muli %arg0, %c1_i32 : i32
    %1 = arith.addi %0, %arg1 : i32
    %c0_i32 = arith.constant 0 : i32
    %c0_i32_0 = arith.constant 0 : i32
    return %1, %c0_i32 : i32, i32
  }
  func.func @transform_6(%arg0: i32, %arg1: i32) -> (i32, i32, i32) {
    %c0_i32 = arith.constant 0 : i32
    %c0_i32_0 = arith.constant 0 : i32
    %c0_i32_1 = arith.constant 0 : i32
    return %arg0, %c0_i32, %c0_i32_0 : i32, i32, i32
  }
  func.func @transform_7(%arg0: i32, %arg1: i32) -> (i32, i32, i32) {
    %c0_i32 = arith.constant 0 : i32
    %c0_i32_0 = arith.constant 0 : i32
    %c0_i32_1 = arith.constant 0 : i32
    return %arg0, %c0_i32, %c0_i32_0 : i32, i32, i32
  }
}

</mosaic_0001>

<bundles_post_ra>
// kernel: tpu_custom_call.1
= control target key start
LH: loop header
LB: loop body
LE: loop exit
PB: predicated region body
PF: predicated region fallthrough
CT: control target
= control target key end

     0   :  { %13 = vsyncpa [#allocation6], 0  ;;  %s527_s0 = inlined_call_operand.hbm [shape: f32[2], index: 0, kind: input, shape index: {}]   ;;  %s528_s1 = inlined_call_operand.hbm [shape: f32[8,16], index: 1, kind: input, shape index: {}]   ;;  %s529_s2 = inlined_call_operand.hbm [shape: f32[8,16], index: 2, kind: input, shape index: {}]   ;;  %s530_s3 = inlined_call_operand.hbm [shape: f32[8,16], index: 3, kind: input, shape index: {}]   ;;  %s531_s4 = inlined_call_operand.hbm [shape: f32[8,16], index: 4, kind: input, shape index: {}]   ;;  %s532_s5 = inlined_call_operand.vmem [shape: f32[8,16], index: 5, kind: input, shape index: {}]   ;;  %s533_s6 = inlined_call_operand.hbm [shape: f32[1,8,128], index: 6, kind: output, shape index: {0}]   ;;  %s534_s7 = inlined_call_operand.hbm [shape: f32[1,8,128], index: 7, kind: output, shape index: {1}]  }
   0x1   :  { %14 = vsyncpa [#allocation4], 0 }
   0x2   :  { %15 = vsyncpa [#allocation9], 0 }
   0x3   :  { %16 = vsyncpa [#allocation12], 0 }
   0x4   :  { %17 = vsyncpa [#allocation5], 0 }
   0x5   :  { %18 = vsyncpa [#allocation15], 0  ;;  %s447_s24 = smov [#allocation8]   ;;  %s448_s26 = smov [#allocation7]  }
   0x6   :  { %s49_s25 = sshll.u32 %s447_s24, 4  ;;  %s36_s27 = sshll.u32 %s448_s26, 4  ;;  %s50_s25 = int_to_ptr.vmem [resolvable:$true] %s49_s25  ;;  %s37_s27 = int_to_ptr.vmem [resolvable:$true] %s36_s27 }
   0x7   :  { %s315_s28 = scalar_lea.vmem %s50_s25, 128  ;;  %p320_p1 = scmp.lt.s32.totalorder %s50_s25, %s50_s25 }
   0x8   :  { %p316_p0 = scmp.ne.s32.totalorder %s50_s25, %s315_s28  ;;  %p321_p2 = scmp.lt.s32.totalorder %s315_s28, %s315_s28 }
   0xa   :  { %p322_p3 = por %p321_p2, %p320_p1 }
   0xc   :  { %p323_p4 = pnand %p322_p3, %p316_p0 }
   0xe   :  { %326 = shalt.err (!%p323_p4)
}
   0xf   :  { %52 = dma.hbm_to_vmem [thread:$0]  %s529_s2, 128, %s50_s25, [#allocation9]  }
  0x10   :  { %s449_s8 = smov [#allocation3]   ;;  %s343_s11 = scalar_lea.vmem %s37_s27, 128 }
  0x11   :  { %26 = dma.hbm_to_smem %s527_s0, 16, %s449_s8, [#allocation6]  }
  0x12   :  { %p344_p5 = scmp.ne.s32.totalorder %s37_s27, %s343_s11  ;;  %p348_p6 = scmp.lt.s32.totalorder %s37_s27, %s37_s27 }
  0x13   :  { %p349_p7 = scmp.lt.s32.totalorder %s343_s11, %s343_s11 }
  0x15   :  { %p350_p8 = por %p349_p7, %p348_p6 }
  0x17   :  { %p351_p9 = pnand %p350_p8, %p344_p5 }
  0x19   :  { %354 = shalt.err (!%p351_p9)
}
  0x1a   :  { %39 = dma.hbm_to_vmem [thread:$0]  %s528_s1, 128, %s37_s27, [#allocation4]  }
  0x1b   :  { %s450_s14 = smov [#allocation10]   ;;  %s451_s2 = smov [#allocation11]  }
  0x1c   :  { %s62_s15 = sshll.u32 %s450_s14, 4  ;;  %s75_s16 = sshll.u32 %s451_s2, 4  ;;  %s63_s15 = int_to_ptr.vmem [resolvable:$true] %s62_s15  ;;  %s76_s16 = int_to_ptr.vmem [resolvable:$true] %s75_s16 }
  0x1d   :  { %s363_s17 = scalar_lea.vmem %s63_s15, 128  ;;  %p368_p11 = scmp.lt.s32.totalorder %s63_s15, %s63_s15 }
  0x1e   :  { %p364_p10 = scmp.ne.s32.totalorder %s63_s15, %s363_s17  ;;  %p369_p12 = scmp.lt.s32.totalorder %s363_s17, %s363_s17 }
  0x20   :  { %p370_p13 = por %p369_p12, %p368_p11 }
  0x22   :  { %p371_p0 = pnand %p370_p13, %p364_p10 }
  0x24   :  { %374 = shalt.err (!%p371_p0)
}
  0x25   :  { %65 = dma.hbm_to_vmem [thread:$0]  %s530_s3, 128, %s63_s15, [#allocation9]  }
  0x26   :  { %s383_s19 = scalar_lea.vmem %s76_s16, 128  ;;  %p388_p2 = scmp.lt.s32.totalorder %s76_s16, %s76_s16 }
  0x27   :  { %p384_p1 = scmp.ne.s32.totalorder %s76_s16, %s383_s19  ;;  %p389_p3 = scmp.lt.s32.totalorder %s383_s19, %s383_s19 }
  0x29   :  { %p390_p4 = por %p389_p3, %p388_p2 }
  0x2b   :  { %p391_p5 = pnand %p390_p4, %p384_p1 }
  0x2d   :  { %394 = shalt.err (!%p391_p5)
}
  0x2e   :  { %78 = dma.hbm_to_vmem [thread:$0]  %s531_s4, 128, %s76_s16, [#allocation12]  }
  0x2f   :  { %435 = dma.done.wait [#allocation6], 16  }
  0x30   :  { %436 = vsyncadd [#allocation6], 4294967280 }
  0x31   :  { %437 = dma.done.wait [#allocation4], 128  }
  0x32   :  { %438 = vsyncadd [#allocation4], 4294967168 }
  0x33   :  { %439 = dma.done.wait [#allocation9], 256  }
  0x34   :  { %440 = vsyncadd [#allocation9], 4294967040 }
  0x35   :  { %441 = dma.done.wait [#allocation12], 128  }
  0x36   :  { %442 = vsyncadd [#allocation12], 4294967168 }
  0x37   :  { %102 = sfence }
  0x38   :  { %v120_v0 = vld [vmem:[#allocation7] sm:$0xff]  ;;  %vm128_vm0 = vcmask 130048   ;;  %s277_s3 = sld [smem:[#allocation3 + $0x1]]  ;;  %v124_v2 = vld [vmem:[#allocation10] sm:$0xff]  ;;  %v121_v3 = vld [vmem:[#allocation8] sm:$0xff]  ;;  %s452_s25 = smov [#allocation13]  }
  0x39   :  { %v129_v1 = vsel %vm128_vm0, %v120_v0, -inf  ;;  %v126_v24 = vld [vmem:[#allocation11] sm:$0xff]  ;;  %s118_s4 = sld [smem:[#allocation3]]  ;;  %s245_s26 = sshll.u32 %s452_s25, 4  ;;  %s246_s26 = int_to_ptr.vmem [resolvable:$true] %s245_s26 }
  0x3a   :  { %130 = vmax.xlane.f32.xlu0 %v129_v1  ;;  %vm184_vm1 = vcmp.gt.f32.partialorder %v126_v24, 0.0  ;;  %v127_v37 = vld [vmem:[%s532_s5] sm:$0xff]  ;;  %s395_s29 = scalar_lea.vmem %s246_s26, 128  ;;  %p400_p7 = scmp.lt.s32.totalorder %s246_s26, %s246_s26 }
  0x3b   :  { %v185_v25 = vsel %vm184_vm1, %v126_v24, 1.0  ;;  %p396_p6 = scmp.ne.s32.totalorder %s246_s26, %s395_s29  ;;  %p401_p8 = scmp.lt.s32.totalorder %s395_s29, %s395_s29 }
  0x3d   :  { %p402_p9 = por %p401_p8, %p400_p7 }
  0x3e   :  { %v122_v4 = vstv %s277_s3 }
  0x3f   :  { %v125_v5 = vmul.f32 %v124_v2, %v122_v4  ;;  %v123_v6 = vmul.f32 %v122_v4, %v121_v3  ;;  %s180_s21 = ssub.f32 1.0, %s118_s4  ;;  %v178_v38 = vstv %s118_s4  ;;  %p403_p10 = pnand %p402_p9, %p396_p6 }
  0x40   :  { %v179_v42 = vmul.f32 %v178_v38, %v126_v24 }
  0x41   :  { %v165_v7 = vsel %vm128_vm0, %v125_v5, -inf  ;;  %v153_v8 = vsel %vm128_vm0, %v123_v6, -inf  ;;  %v181_v39 = vstv %s180_s21 }
  0x42   :  { %166 = vmax.xlane.f32.xlu1 %v165_v7  ;;  %154 = vmax.xlane.f32.xlu0 %v153_v8  ;;  %v182_v43 = vmul.f32 %v181_v39, %v127_v37 }
  0x44   :  { %v183_v49 = vadd.f32 %v182_v43, %v179_v42 }
  0xc3   :  { %v131_v9 = vpop.xlane.xlu0 %130 }
  0xc4   :  { %v132_v10 = vsub.f32 %v120_v0, %v131_v9 }
  0xc6   :  { %v133_v11 = vmul.f32 1.442695, %v132_v10 }
  0xc8   :  { %293 = vpow2.f32 %v133_v11 }
  0xcb   :  { %v167_v12 = vpop.xlane.xlu1 %166  ;;  %v155_v13 = vpop.xlane.xlu0 %154 }
  0xcc   :  { %v168_v14 = vsub.f32 %v125_v5, %v167_v12  ;;  %v156_v15 = vsub.f32 %v123_v6, %v155_v13 }
  0xce   :  { %v169_v16 = vmul.f32 1.442695, %v168_v14  ;;  %v157_v17 = vmul.f32 1.442695, %v156_v15 }
  0xd0   :  { %295 = vpow2.f32 %v169_v16 }
  0xd1   :  { %297 = vpow2.f32 %v157_v17 }
  0xd2   :  { %299 = vlog2.f32 %v185_v25 }
  0xd5   :  { %v294_v18 = vpop.eup %293 }
  0xd6   :  { %v135_v19 = vsel %vm128_vm0, %v294_v18, 0.0 }
  0xd7   :  { %136 = vadd.xlane.f32.xlu1 %v135_v19 }
  0xdd   :  { %v296_v20 = vpop.eup %295 }
  0xde   :  { %v298_v21 = vpop.eup %297  ;;  %v171_v22 = vsel %vm128_vm0, %v296_v20, 0.0 }
  0xdf   :  { %172 = vadd.xlane.f32.xlu1 %v171_v22  ;;  %v159_v23 = vsel %vm128_vm0, %v298_v21, 0.0  ;;  %v300_v26 = vpop.eup %299 }
  0xe0   :  { %160 = vadd.xlane.f32.xlu0 %v159_v23  ;;  %v187_v27 = vmul.f32 0.6931472, %v300_v26 }
  0xe2   :  { %v188_v28 = vmul.f32 %v187_v27, %v126_v24 }
  0xe4   :  { %v189_v29 = vsel %vm128_vm0, %v188_v28, 0.0 }
  0xe5   :  { %190 = vadd.xlane.f32.xlu1 %v189_v29 }
 0x160   :  { %v137_v30 = vpop.xlane.xlu1 %136 }
 0x161   :  { %301 = vlog2.f32 %v137_v30 }
 0x168   :  { %v173_v31 = vpop.xlane.xlu1 %172 }
 0x169   :  { %303 = vlog2.f32 %v173_v31  ;;  %v161_v32 = vpop.xlane.xlu0 %160 }
 0x16a   :  { %305 = vlog2.f32 %v161_v32 }
 0x16e   :  { %v302_v33 = vpop.eup %301  ;;  %v191_v53 = vpop.xlane.xlu1 %190 }
 0x16f   :  { %v139_v34 = vmul.f32 0.6931472, %v302_v33  ;;  %v192_v54 = vrot.slane %v191_v53, 4 }
 0x171   :  { %v140_v35 = vsub.f32 %v132_v10, %v139_v34  ;;  %v193_v55 = vadd.f32 %v192_v54, %v191_v53 }
 0x173   :  { %v141_v36 = vmul.f32 %v140_v35, %v126_v24  ;;  %v194_v56 = vrot.slane %v193_v55, 2 }
 0x175   :  { %v142_v40 = vsel %vm128_vm0, %v141_v36, 0.0  ;;  %v195_v59 = vadd.f32 %v194_v56, %v193_v55 }
 0x176   :  { %v304_v41 = vpop.eup %303  ;;  %143 = vadd.xlane.f32.xlu0 %v142_v40 }
 0x177   :  { %v306_v44 = vpop.eup %305  ;;  %v175_v45 = vmul.f32 0.6931472, %v304_v41  ;;  %v196_v62 = vrot.slane %v195_v59, 1 }
 0x178   :  { %v163_v46 = vmul.f32 0.6931472, %v306_v44 }
 0x179   :  { %v176_v47 = vsub.f32 %v168_v14, %v175_v45  ;;  %v197_v1 = vadd.f32 %v196_v62, %v195_v59 }
 0x17a   :  { %v164_v48 = vsub.f32 %v156_v15, %v163_v46 }
 0x17c   :  { %v177_v50 = vadd.f32 %v176_v47, %v164_v48 }
 0x17e   :  { %v200_v51 = vmul.f32 %v183_v49, %v177_v50 }
 0x180   :  { %v201_v52 = vsel %vm128_vm0, %v200_v51, 0.0 }
 0x181   :  { %202 = vadd.xlane.f32.xlu0 %v201_v52 }
 0x1ff   :  { %v144_v57 = vpop.xlane.xlu0 %143 }
 0x200   :  { %v145_v58 = vrot.slane %v144_v57, 4 }
 0x202   :  { %v146_v60 = vadd.f32 %v145_v58, %v144_v57 }
 0x204   :  { %v147_v61 = vrot.slane %v146_v60, 2 }
 0x206   :  { %v148_v63 = vadd.f32 %v147_v61, %v146_v60 }
 0x208   :  { %v149_v0 = vrot.slane %v148_v63, 1 }
 0x20a   :  { %v203_v2 = vpop.xlane.xlu0 %202  ;;  %v150_v3 = vadd.f32 %v149_v0, %v148_v63 }
 0x20b   :  { %v204_v4 = vrot.slane %v203_v2, 4 }
 0x20c   :  { %280 = vpush %v150_v3 }
 0x20d   :  { %v205_v5 = vadd.f32 %v204_v4, %v203_v2  ;;  %282 = vpush %v197_v1 }
 0x20f   :  { %v206_v6 = vrot.slane %v205_v5, 2 }
 0x211   :  { %v207_v7 = vadd.f32 %v206_v6, %v205_v5 }
 0x213   :  { %v208_v8 = vrot.slane %v207_v7, 1 }
 0x215   :  { %v209_v9 = vadd.f32 %v208_v8, %v207_v7 }
 0x217   :  { %284 = vpush %v209_v9 }
 0x23d   :  { %s281_s5 = spop %280 }
 0x23e   :  { %s152_s24 = ssub.f32 0.0, %s281_s5  ;;  %s283_s28 = spop %282 }
 0x240   :  { %s232_s27 = smul.f32 0.125, %s152_s24 }
 0x242   :  { %v233_v10 = vstv %s232_s27 }
 0x243   :  { %234 = vst [vmem:[#allocation13] sm:$0xff] %v233_v10 }
 0x244   :  { %406 = shalt.err (!%p403_p10)
}
 0x245   :  { %248 = dma.vmem_to_hbm [thread:$0]  %s246_s26, 128, %s533_s6, [#allocation5]  }
 0x246   :  { %s199_s9 = smul.f32 2.0, %s283_s28  ;;  %s453_s12 = smov [#allocation14]  }
 0x247   :  { %s255_s13 = sshll.u32 %s453_s12, 4  ;;  %s256_s13 = int_to_ptr.vmem [resolvable:$true] %s255_s13 }
 0x248   :  { %s285_s10 = spop %284  ;;  %s415_s15 = scalar_lea.vmem %s256_s13, 128 }
 0x249   :  { %s211_s11 = ssub.f32 %s199_s9, %s285_s10  ;;  %p416_p11 = scmp.ne.s32.totalorder %s256_s13, %s415_s15 }
 0x24a   :  { %p420_p12 = scmp.lt.s32.totalorder %s256_s13, %s256_s13  ;;  %p421_p13 = scmp.lt.s32.totalorder %s415_s15, %s415_s15 }
 0x24b   :  { %s236_s14 = smul.f32 0.125, %s211_s11 }
 0x24c   :  { %p422_p0 = por %p421_p13, %p420_p12 }
 0x24d   :  { %v237_v11 = vstv %s236_s14 }
 0x24e   :  { %238 = vst [vmem:[#allocation14] sm:$0xff] %v237_v11  ;;  %p423_p1 = pnand %p422_p0, %p416_p11 }
 0x250   :  { %426 = shalt.err (!%p423_p1)
}
 0x251   :  { %258 = dma.vmem_to_hbm [thread:$0]  %s256_s13, 128, %s534_s7, [#allocation15]  }
 0x252   :  { %443 = dma.done.wait [#allocation5], 128  }
 0x253   :  { %444 = vsyncadd [#allocation5], 4294967168 }
 0x254   :  { %445 = dma.done.wait [#allocation15], 128  }
 0x255   :  { %446 = vsyncadd [#allocation15], 4294967168 }
 0x256   :  { %265 = vsyncpa [#allocation4], 1 }
 0x257   :  { %266 = vsyncpa [#allocation9], 1 }
 0x258   :  { %267 = vsyncpa [#allocation12], 1 }
 0x259   :  { %268 = vsyncpa [#allocation5], 1 }
 0x25a   :  { %269 = vsyncpa [#allocation15], 1 }
 0x25b   :  { %270 = vsyncpa [#allocation6], 1 }

</bundles_post_ra>
